<compile_context>
chip_gen: v6e
topology: v6e:2x2x1
jax: 0.10.0
libtpu: 0.0.40
codegen_flags: <defaults>
</compile_context>

<pallas_src>
import functools

import jax
import jax.numpy as jnp
from jax import lax
from jax.experimental import pallas as pl
from jax.experimental.pallas import tpu as pltpu

_SUBLANE = 8
_LANE = 128
_SMALL_HW_FALLBACK = 128  # below one lane-tile of useful data, use plain XLA


def _vmem_capacity_bytes() -> int:
    """Physical VMEM per core; conservative (v7x) fallback if unqueryable."""
    try:
        info = pltpu.get_tpu_info()
        for attr in ("vmem_capacity_bytes", "vmem_size_bytes", "vmem_bytes"):
            v = getattr(info, attr, None)
            if v:
                return int(v)
    except Exception:
        pass
    return 64 << 20


def _num_tensorcores() -> int:
    """2 on v7x-style megacore chips, 1 on v5e/v6e."""
    try:
        kind = str(getattr(jax.devices()[0], "device_kind", "")).lower()
        if "v7" in kind or "tpu7" in kind:
            return 2
    except Exception:
        pass
    return 1


def _pool_single_kernel(x_ref, out_ref, *, inv_hw):
    """Whole spatial extent in one block: single pass, no accumulators."""
    x = x_ref[...]                                             # (row_tile, hw)
    out_ref[:, 0:1] = jnp.max(x, axis=-1, keepdims=True).astype(out_ref.dtype)
    s = jnp.sum(x.astype(jnp.float32), axis=-1, keepdims=True)
    out_ref[:, 1:2] = (s * inv_hw).astype(out_ref.dtype)


def _pool_tiled_kernel(x_ref, out_ref, max_acc, sum_acc, *,
                       hw, hw_tile, inv_hw, needs_mask):
    """Grid = (row blocks [parallel], hw blocks [arbitrary reduction])."""
    k = pl.program_id(1)
    last = pl.num_programs(1) - 1

    @pl.when(k == 0)
    def _init():
        max_acc[...] = jnp.full_like(max_acc, -jnp.inf)
        sum_acc[...] = jnp.zeros_like(sum_acc)

    def _accumulate(x_max, x_sum):
        # Max stays in the native dtype (exact); only the reduced column and
        # the mean path are accumulated in f32.
        max_acc[...] = jnp.maximum(
            max_acc[...],
            jnp.max(x_max, axis=-1, keepdims=True).astype(jnp.float32))
        sum_acc[...] += jnp.sum(x_sum, axis=-1, keepdims=True)

    if needs_mask:
        # Ragged hw tail: pay the iota/compare/select on the final block only.
        @pl.when(k < last)
        def _fast():
            x = x_ref[...]
            _accumulate(x, x.astype(jnp.float32))

        @pl.when(k == last)
        def _masked():
            x = x_ref[...]
            col = k * hw_tile + lax.broadcasted_iota(jnp.int32, x.shape, 1)
            valid = col < hw
            _accumulate(
                jnp.where(valid, x, jnp.array(-jnp.inf, dtype=x.dtype)),
                jnp.where(valid, x.astype(jnp.float32), 0.0))
    else:
        x = x_ref[...]
        _accumulate(x, x.astype(jnp.float32))

    @pl.when(k == last)
    def _finalize():
        out_ref[:, 0:1] = max_acc[...].astype(out_ref.dtype)
        out_ref[:, 1:2] = (sum_acc[...] * inv_hw).astype(out_ref.dtype)


def _choose_tiles(rows, hw, itemsize, budget_bytes, num_cores):
    """Pick (row_tile, hw_tile, tiled) so total in-flight VMEM <= budget.

    Per-row cost counts: double-buffered input block, the lane-padded
    (row, 2) output block (double-buffered), and (tiled path only) two
    lane-padded f32 accumulators.
    """
    out_bytes_per_row = 2 * _LANE * itemsize                  # padded output, 2 bufs
    acc_bytes_per_row = 2 * _LANE * 4                         # two f32 accumulators

    min_rows = min(rows, _SUBLANE)
    per_row_single = 2 * hw * itemsize + out_bytes_per_row
    if min_rows * per_row_single <= budget_bytes:
        # Whole spatial extent fits in one block even for a minimal row strip.
        max_rows = budget_bytes // per_row_single
        if num_cores >= 2 and rows > _SUBLANE:
            # Keep >=2 row blocks so the "parallel" axis splits across TCs.
            per_core = pl.cdiv(pl.cdiv(rows, num_cores), _SUBLANE) * _SUBLANE
            max_rows = min(max_rows, per_core)
        row_tile = min(rows, max(_SUBLANE, max_rows))
        if row_tile < rows:
            row_tile = max(_SUBLANE, (row_tile // _SUBLANE) * _SUBLANE)
        return row_tile, hw, False

    # Huge spatial map: minimal row strip, tile the reduction (hw) axis.
    row_tile = min_rows
    hw_budget = budget_bytes // row_tile - out_bytes_per_row - acc_bytes_per_row
    hw_tile = (hw_budget // (2 * itemsize)) // _LANE * _LANE
    hw_tile = min(hw, max(_LANE, hw_tile))
    return row_tile, hw_tile, True


def adaptive_concat_pool2d(x: jax.Array, *, _hw_tile_override=None) -> jax.Array:
    """x: (N, C, H, W) -> (N, 2*C, 1, 1)  (max-pool channels first, then avg)."""
    if not jnp.issubdtype(x.dtype, jnp.floating):
        raise TypeError("adaptive_concat_pool2d: floating-point input required, "
                        f"got {x.dtype}")
    N, C, H, W = x.shape
    rows = N * C
    hw = H * W

    if hw < _SMALL_HW_FALLBACK:
        # < 1 useful lane-tile per row: XLA reduction is already at roofline.
        mx = jnp.max(x, axis=(2, 3), keepdims=True)
        av = jnp.mean(x, axis=(2, 3), keepdims=True)
        return jnp.concatenate([mx, av], axis=1)

    itemsize = jnp.dtype(x.dtype).itemsize
    x_flat = x.reshape(rows, hw)
    inv_hw = 1.0 / float(hw)

    vmem_cap = _vmem_capacity_bytes()
    limit_ceiling = min(vmem_cap - (16 << 20), (vmem_cap * 3) // 4)  # 48 MiB v7x / 96 MiB v5e,v6e
    budget = limit_ceiling - (4 << 20)                               # headroom for Mosaic scratch
    num_cores = _num_tensorcores()

    row_tile, hw_tile, tiled = _choose_tiles(rows, hw, itemsize, budget, num_cores)
    if _hw_tile_override is not None:                                # testing hook
        hw_tile = min(hw, int(_hw_tile_override))
        tiled = hw_tile < hw

    grid_rows = pl.cdiv(rows, row_tile)

    if not tiled:
        kernel = functools.partial(_pool_single_kernel, inv_hw=inv_hw)
        grid = (grid_rows,)
        in_specs = [pl.BlockSpec((row_tile, hw_tile), lambda i: (i, 0))]
        out_specs = pl.BlockSpec((row_tile, 2), lambda i: (i, 0))
        scratch_shapes = []
        semantics = ("parallel",)
    else:
        needs_mask = (hw % hw_tile) != 0
        kernel = functools.partial(_pool_tiled_kernel, hw=hw, hw_tile=hw_tile,
                                   inv_hw=inv_hw, needs_mask=needs_mask)
        grid = (grid_rows, pl.cdiv(hw, hw_tile))
        in_specs = [pl.BlockSpec((row_tile, hw_tile), lambda i, k: (i, k))]
        out_specs = pl.BlockSpec((row_tile, 2), lambda i, k: (i, 0))
        scratch_shapes = [
            pltpu.VMEM((row_tile, 1), jnp.float32),  # running max
            pltpu.VMEM((row_tile, 1), jnp.float32),  # running sum
        ]
        semantics = ("parallel", "arbitrary")

    # Scoped-VMEM limit: double-buffered input + lane-padded output (+ scratch)
    # + headroom, capped so it is valid on v7x's 64 MiB physical VMEM.
    usage = row_tile * (2 * hw_tile * itemsize
                        + 2 * _LANE * itemsize
                        + (2 * _LANE * 4 if tiled else 0))
    vmem_limit = int(min(limit_ceiling, max(32 << 20, usage + (4 << 20))))

    out = pl.pallas_call(
        kernel,
        out_shape=jax.ShapeDtypeStruct((rows, 2), x.dtype),
        grid_spec=pltpu.PrefetchScalarGridSpec(
            num_scalar_prefetch=0,
            grid=grid,
            in_specs=in_specs,
            out_specs=out_specs,
            scratch_shapes=scratch_shapes,
        ),
        compiler_params=pltpu.CompilerParams(
            dimension_semantics=semantics,
            vmem_limit_bytes=vmem_limit,
        ),
    )(x_flat)

    max_pool = out[:, 0].reshape(N, C, 1, 1)
    avg_pool = out[:, 1].reshape(N, C, 1, 1)
    # torch.cat([self.mp(x), self.ap(x)], 1): max first, then avg, on channels.
    return jnp.concatenate([max_pool, avg_pool], axis=1)


def _reference(x):
    ref_max = jnp.max(x, axis=(2, 3), keepdims=True)
    ref_avg = jnp.mean(x, axis=(2, 3), keepdims=True)
    return jnp.concatenate([ref_max, ref_avg], axis=1)


if __name__ == "__main__":
    key = jax.random.PRNGKey(0)

    # Primary small test (module-implied shape): single-pass kernel path.
    x = jax.random.normal(key, (2, 4, 16, 16), dtype=jnp.float32)
    out = jax.block_until_ready(adaptive_concat_pool2d(x))
    assert out.shape == (2, 8, 1, 1), out.shape
    assert jnp.allclose(out, _reference(x), atol=1e-5, rtol=1e-5), "mismatch (primary)"

    # Multi-row-block grid path.
    x2 = jax.random.normal(jax.random.PRNGKey(0), (2, 64, 16, 16), dtype=jnp.float32)
    out2 = jax.block_until_ready(adaptive_concat_pool2d(x2))
    assert out2.shape == (2, 128, 1, 1), out2.shape
    assert jnp.allclose(out2, _reference(x2), atol=1e-5, rtol=1e-5), "mismatch (rows)"

    # Tiled + ragged hw reduction path (forced small hw tile to exercise it).
    x3 = jax.random.normal(jax.random.PRNGKey(0), (1, 8, 20, 20), dtype=jnp.float32)
    out3 = jax.block_until_ready(adaptive_concat_pool2d(x3, _hw_tile_override=128))
    assert out3.shape == (1, 16, 1, 1), out3.shape
    assert jnp.allclose(out3, _reference(x3), atol=1e-5, rtol=1e-5), "mismatch (tiled)"

    # Tiny spatial map: plain XLA fallback.
    x4 = jax.random.normal(jax.random.PRNGKey(0), (2, 4, 8, 8), dtype=jnp.float32)
    out4 = jax.block_until_ready(adaptive_concat_pool2d(x4))
    assert out4.shape == (2, 8, 1, 1), out4.shape
    assert jnp.allclose(out4, _reference(x4), atol=1e-6, rtol=1e-6), "mismatch (small hw)"

    print("KERNEL_OK")
</pallas_src>

<mosaic_0001>
module attributes {stable_mosaic.version = 11 : i64} {
  func.func @_pool_single_kernel(%arg0: i32, %arg1: memref<8x256xf32, #tpu.memory_space<vmem>>, %arg2: memref<8x2xf32, #tpu.memory_space<vmem>>) attributes {dimension_semantics = [#tpu.dimension_semantics<parallel>], iteration_bounds = array<i64: 1>, scalar_prefetch = 0 : i64, scratch_operands = 0 : i64, tpu.core_type = #tpu.core_type<tc>, window_params = [{transform_indices = @transform_0, window_bounds = array<i64: 8, 256>}, {transform_indices = @transform_1, window_bounds = array<i64: 8, 2>}]} {
    %c0 = arith.constant 0 : index
    %c0_0 = arith.constant 0 : index
    %0 = vector.load %arg1[%c0, %c0_0] : memref<8x256xf32, #tpu.memory_space<vmem>>, vector<8x256xf32>
    %cst = arith.constant dense<0xFF800000> : vector<8xf32>
    %1 = vector.multi_reduction <maximumf>, %0, %cst [1] : vector<8x256xf32> to vector<8xf32>
    %2 = vector.shape_cast %1 : vector<8xf32> to vector<8x1xf32>
    %c0_1 = arith.constant 0 : index
    %c0_2 = arith.constant 0 : index
    %3 = vector.load %arg2[%c0_1, %c0_2] : memref<8x2xf32, #tpu.memory_space<vmem>>, vector<8x1xf32>
    tpu.vector_store %arg2[%c0_1, %c0_2], %2 {strides = array<i32>} : memref<8x2xf32, #tpu.memory_space<vmem>>, vector<8x1xf32>,
    %cst_3 = arith.constant dense<0.000000e+00> : vector<8xf32>
    %4 = vector.multi_reduction <add>, %0, %cst_3 [1] : vector<8x256xf32> to vector<8xf32>
    %5 = vector.shape_cast %4 : vector<8xf32> to vector<8x1xf32>
    %cst_4 = arith.constant 3.906250e-03 : f32
    %6 = vector.broadcast %cst_4 : f32 to vector<8x1xf32>
    %7 = arith.mulf %5, %6 : vector<8x1xf32>
    %c0_5 = arith.constant 0 : index
    %c1 = arith.constant 1 : index
    %8 = vector.load %arg2[%c0_5, %c1] : memref<8x2xf32, #tpu.memory_space<vmem>>, vector<8x1xf32>
    tpu.vector_store %arg2[%c0_5, %c1], %7 {strides = array<i32>} : memref<8x2xf32, #tpu.memory_space<vmem>>, vector<8x1xf32>,
    return
  }
  func.func @transform_0(%arg0: i32) -> (i32, i32) {
    %c0_i32 = arith.constant 0 : i32
    %c0_i32_0 = arith.constant 0 : i32
    return %arg0, %c0_i32 : i32, i32
  }
  func.func @transform_1(%arg0: i32) -> (i32, i32) {
    %c0_i32 = arith.constant 0 : i32
    %c0_i32_0 = arith.constant 0 : i32
    return %arg0, %c0_i32 : i32, i32
  }
}

</mosaic_0001>

<bundles_post_ra>
// kernel: tpu_custom_call.1
= control target key start
LH: loop header
LB: loop body
LE: loop exit
PB: predicated region body
PF: predicated region fallthrough
CT: control target
= control target key end

     0   :  { %6 = vsyncpa [#allocation3], 0  ;;  %s61_s6 = smov [#allocation2]   ;;  %s81_s0 = inlined_call_operand.hbm [shape: f32[8,256], index: 0, kind: input, shape index: {}]   ;;  %s82_s1 = inlined_call_operand.vmem [shape: f32[8,2], index: 1, kind: output, shape index: {}]  }
   0x1   :  { %s13_s7 = sshll.u32 %s61_s6, 4  ;;  %s14_s7 = int_to_ptr.vmem [resolvable:$true] %s13_s7 }
   0x2   :  { %s47_s8 = scalar_lea.vmem %s14_s7, 256  ;;  %p52_p1 = scmp.lt.s32.totalorder %s14_s7, %s14_s7 }
   0x3   :  { %p48_p0 = scmp.ne.s32.totalorder %s14_s7, %s47_s8  ;;  %p53_p2 = scmp.lt.s32.totalorder %s47_s8, %s47_s8 }
   0x5   :  { %p54_p3 = por %p53_p2, %p52_p1 }
   0x7   :  { %p55_p4 = pnand %p54_p3, %p48_p0 }
   0x9   :  { %58 = shalt.err (!%p55_p4)
}
   0xa   :  { %16 = dma.hbm_to_vmem [thread:$0]  %s81_s0, 256, %s14_s7, [#allocation3]  }
   0xb   :  { %59 = dma.done.wait [#allocation3], 256  }
   0xc   :  { %60 = vsyncadd [#allocation3], 4294967040  ;;  %v20_v0 = vld [vmem:[#allocation2] sm:$0xff]  ;;  %v21_v1 = vld [vmem:[#allocation2 + $0x8] sm:$0xff]  ;;  %vm25_vm0 = vcmask 7168   ;;  %vm31_vm1 = vcmask 15368  }
   0xd   :  { %v27_v2 = vadd.f32 %v21_v1, %v20_v0  ;;  %v22_v3 = vmax.f32 %v20_v0, %v21_v1 }
   0xf   :  { %28 = vadd.xlane.f32.xlu0 %v27_v2 }
  0x13   :  { %23 = vmax.xlane.f32.xlu0 %v22_v3 }
  0x98   :  { %v29_v4 = vpop.xlane.xlu0 %28 }
  0x99   :  { %v30_v5 = vmul.f32 0.00390625, %v29_v4 }
  0x9c   :  { %v24_v6 = vpop.xlane.xlu0 %23 }
  0x9d   :  { %26 = vst.msk [vmem:[%s82_s1] sm:$0xff] %vm25_vm0, %v24_v6 }
  0x9e   :  { %32 = vst.msk [vmem:[%s82_s1] sm:$0xff] %vm31_vm1, %v30_v5 }
  0x9f   :  { %37 = vsyncpa [#allocation3], 1 }

</bundles_post_ra>
